<compile_context>
chip_gen: v5e
topology: v5e:2x2
jax: 0.10.0
libtpu: 0.0.40
codegen_flags: <defaults>
</compile_context>

<pallas_src>
import jax
import jax.numpy as jnp
import numpy as np
from jax.experimental import pallas as pl
from jax.experimental.pallas import tpu as pltpu

BETA = 0.99       # snn.Leaky beta (first step: mem = beta*0 + input, numerically unused)
THRESHOLD = 1.0   # snn.Leaky default threshold
EPS = 1e-5        # BatchNorm2d default eps

_LANE = 128
_MAX_TILE = 2048                 # lanes per N-tile (512-2048 ~ HBM roofline; v7x-safe VMEM)
_VMEM_LIMIT = 32 * 1024 * 1024   # explicit scoped-VMEM cap (way above actual usage)


def _conv_tile(w, xcol_ref):
    """K-tap Conv2d(1->O,(1,K)) on one lane tile: (O,K) x (K,TN) -> (O,TN) VPU MACs."""
    xc = xcol_ref[...]                               # (K, TN)
    acc = w[:, 0:1] * xc[0:1, :]
    for k in range(1, w.shape[1]):
        acc = acc + w[:, k:k + 1] * xc[k:k + 1, :]
    return acc


def _stats_kernel(w_ref, xcol_ref, sum_ref, sumsq_ref):
    """Sweep 1: per-channel sum / sum-of-squares of the bias-free conv output."""
    @pl.when(pl.program_id(0) == 0)
    def _():
        sum_ref[...] = jnp.zeros_like(sum_ref)
        sumsq_ref[...] = jnp.zeros_like(sumsq_ref)

    acc = _conv_tile(w_ref[...], xcol_ref)           # (O, TN) f32
    sum_ref[...] += jnp.sum(acc, axis=1, keepdims=True)
    sumsq_ref[...] += jnp.sum(acc * acc, axis=1, keepdims=True)


def _apply_kernel(w_ref, p_ref, xcol_ref, out_ref):
    """Sweep 2: recompute conv per tile; folded BN+threshold compare; bf16 store."""
    acc = _conv_tile(w_ref[...], xcol_ref)           # (O, TN) f32
    scale = p_ref[:, 0:1]                            # gamma * rsqrt(var + eps)
    rhs = p_ref[:, 1:2]                              # mean*scale + (threshold - beta)
    out_ref[...] = (acc * scale > rhs).astype(out_ref.dtype)


def conv_encoder_forward(x, w, b, gamma, beta, kernel_size):
    """x: (B, T, C_in) float32 — same layout the PyTorch module receives.

    Returns spikes of shape (B, O, C_in, T) float32, matching
    ConvEncoder.forward(inputs) (training-mode BN, first LIF step).
    """
    assert kernel_size % 2 == 1, "PyTorch 'same'-length output assumed (odd kernel)."
    B, T, C = x.shape
    O, K = w.shape
    assert K == kernel_size
    pad = kernel_size // 2
    N = B * C * T

    # glue (permute(0,2,1).unsqueeze(1)) + zero padding along seq + im2col to (K, N).
    # Wrapper-side im2col kept: for K=3 its HBM traffic is small vs the spike write.
    xp = jnp.transpose(x, (0, 2, 1)).astype(jnp.float32)            # (B, C, T)
    xpad = jnp.pad(xp, ((0, 0), (0, 0), (pad, pad)))                # (B, C, T+2*pad)
    xcol = jnp.stack([xpad[:, :, k:k + T].reshape(-1) for k in range(K)], axis=0)

    # N-tiling: multiples of 128 lanes, capped at _MAX_TILE; pad N so every store is
    # an unmasked lane-dense vst. Padded columns are all-zero and (bias removed)
    # contribute exactly 0 to both sum and sum-of-squares.
    tn = min(_MAX_TILE, -(-N // _LANE) * _LANE)
    n_tiles = -(-N // tn)
    n_pad = n_tiles * tn
    if n_pad != N:
        xcol = jnp.pad(xcol, ((0, 0), (0, n_pad - N)))

    w32 = w.astype(jnp.float32)
    # Conv bias `b` intentionally unused: a per-channel additive constant cancels
    # exactly under training-mode BatchNorm (mean shifts by b, variance unchanged).

    # ---- sweep 1: batch statistics (reduction over N tiles -> "arbitrary") -------
    stats_sum, stats_sumsq = pl.pallas_call(
        _stats_kernel,
        out_shape=(jax.ShapeDtypeStruct((O, 1), jnp.float32),
                   jax.ShapeDtypeStruct((O, 1), jnp.float32)),
        grid=(n_tiles,),
        in_specs=[
            pl.BlockSpec((O, K), lambda j: (0, 0)),    # conv weights (tiny, constant)
            pl.BlockSpec((K, tn), lambda j: (0, j)),   # xcol lane tile
        ],
        out_specs=[
            pl.BlockSpec((O, 1), lambda j: (0, 0)),    # resident accumulator: sum
            pl.BlockSpec((O, 1), lambda j: (0, 0)),    # resident accumulator: sumsq
        ],
        compiler_params=pltpu.CompilerParams(
            dimension_semantics=("arbitrary",), vmem_limit_bytes=_VMEM_LIMIT),
    )(w32, xcol)

    # ---- tiny per-channel fold (O elements) in the wrapper ------------------------
    inv_n = 1.0 / float(N)                              # true count, excludes padding
    mean = stats_sum * inv_n
    var = jnp.maximum(stats_sumsq * inv_n - mean * mean, 0.0)
    scale = gamma.astype(jnp.float32).reshape(O, 1) * jax.lax.rsqrt(var + EPS)
    rhs = mean * scale + (THRESHOLD - beta.astype(jnp.float32).reshape(O, 1))
    params = jnp.concatenate([scale, rhs], axis=1)      # packed (O, 2) per-channel tile

    # ---- sweep 2: recompute conv per tile, spike = (acc*scale > rhs), bf16 stores -
    spikes = pl.pallas_call(
        _apply_kernel,
        out_shape=jax.ShapeDtypeStruct((O, n_pad), jnp.bfloat16),
        grid=(n_tiles,),
        in_specs=[
            pl.BlockSpec((O, K), lambda j: (0, 0)),    # conv weights
            pl.BlockSpec((O, 2), lambda j: (0, 0)),    # packed [scale, rhs]
            pl.BlockSpec((K, tn), lambda j: (0, j)),   # xcol lane tile
        ],
        out_specs=pl.BlockSpec((O, tn), lambda j: (0, j)),
        compiler_params=pltpu.CompilerParams(
            dimension_semantics=("parallel",), vmem_limit_bytes=_VMEM_LIMIT),
    )(w32, params, xcol)

    # layout plumbing back to the PyTorch output shape (B, O, C, T); 0/1 spikes are
    # exact in bf16, so the f32 cast is lossless and fuses with the transpose pass.
    spikes = spikes[:, :N].astype(jnp.float32)
    return jnp.transpose(spikes.reshape(O, B, C, T), (1, 0, 2, 3))


def _reference_bn(x, w, b, gamma, beta, kernel_size):
    """Pure-JAX reference of conv + training-mode BN (pre-spike values), bias included."""
    B, T, C = x.shape
    O, K = w.shape
    pad = kernel_size // 2
    xp = jnp.transpose(x, (0, 2, 1)).astype(jnp.float32)
    xpad = jnp.pad(xp, ((0, 0), (0, 0), (pad, pad)))
    conv = b[None, :, None, None]
    for k in range(K):
        conv = conv + w[None, :, None, None, k] * xpad[:, None, :, k:k + T]
    mean = conv.mean(axis=(0, 2, 3), keepdims=True)
    var = ((conv - mean) ** 2).mean(axis=(0, 2, 3), keepdims=True)
    bn = (conv - mean) / jnp.sqrt(var + EPS) * gamma[None, :, None, None] \
         + beta[None, :, None, None]
    return bn


if __name__ == "__main__":
    # Small shapes consistent with the module: inputs are (batch, seq_len, channels).
    B, T, C = 2, 16, 4
    OUTPUT_SIZE = 32
    KERNEL_SIZE = 3

    key = jax.random.PRNGKey(0)
    kx, kw, kb = jax.random.split(key, 3)

    x = jax.random.normal(kx, (B, T, C), dtype=jnp.float32)

    # Deterministic parameter init (synthetic, shapes from the module __init__):
    #   Conv2d weight (O, 1, 1, K) -> stored as (O, K); Conv2d bias (O,)
    #   BatchNorm2d default affine init: weight=1, bias=0
    fan_in = float(KERNEL_SIZE)
    bound = 1.0 / np.sqrt(fan_in)
    w = jax.random.uniform(kw, (OUTPUT_SIZE, KERNEL_SIZE), jnp.float32, -bound, bound)
    b = jax.random.uniform(kb, (OUTPUT_SIZE,), jnp.float32, -bound, bound)
    gamma = jnp.ones((OUTPUT_SIZE,), jnp.float32)
    beta = jnp.zeros((OUTPUT_SIZE,), jnp.float32)

    spk = conv_encoder_forward(x, w, b, gamma, beta, KERNEL_SIZE)
    spk = jax.block_until_ready(spk)
    assert spk.shape == (B, OUTPUT_SIZE, C, T), spk.shape

    # Correctness: spikes are a hard threshold of bn, so compare spike patterns and
    # only tolerate flips where the reference bn is within float roundoff of the
    # threshold (different reduction order / folded compare than the XLA reference).
    ref_bn = _reference_bn(x, w, b, gamma, beta, KERNEL_SIZE)
    ref_spk = (ref_bn > THRESHOLD).astype(jnp.float32)
    spk_np = np.asarray(spk)
    ref_spk_np = np.asarray(ref_spk)
    ref_bn_np = np.asarray(ref_bn)
    mismatch = spk_np != ref_spk_np
    if mismatch.any():
        assert np.all(np.abs(ref_bn_np[mismatch] - THRESHOLD) < 1e-4), \
            "spike mismatch away from the threshold boundary"

    print("KERNEL_OK")
</pallas_src>

<mosaic_0001>
module attributes {stable_mosaic.version = 11 : i64} {
  func.func @_stats_kernel(%arg0: i32, %arg1: memref<32x3xf32, #tpu.memory_space<vmem>>, %arg2: memref<3x128xf32, #tpu.memory_space<vmem>>, %arg3: memref<32x1xf32, #tpu.memory_space<vmem>>, %arg4: memref<32x1xf32, #tpu.memory_space<vmem>>) attributes {dimension_semantics = [#tpu.dimension_semantics<arbitrary>], iteration_bounds = array<i64: 1>, scalar_prefetch = 0 : i64, scratch_operands = 0 : i64, tpu.core_type = #tpu.core_type<tc>, window_params = [{pipeline_mode = #tpu.pipeline_mode<synchronous>, transform_indices = @transform_0, window_bounds = array<i64: 32, 3>}, {transform_indices = @transform_1, window_bounds = array<i64: 3, 128>}, {pipeline_mode = #tpu.pipeline_mode<synchronous>, transform_indices = @transform_2, window_bounds = array<i64: 32, 1>}, {pipeline_mode = #tpu.pipeline_mode<synchronous>, transform_indices = @transform_3, window_bounds = array<i64: 32, 1>}]} {
    %c0_i32 = arith.constant 0 : i32
    %0 = arith.cmpi eq, %arg0, %c0_i32 : i32
    %1 = arith.extui %0 : i1 to i32
    %c0_i32_0 = arith.constant 0 : i32
    %2 = arith.cmpi ne, %1, %c0_i32_0 : i32
    scf.if %2 {
      %cst_13 = arith.constant 0.000000e+00 : f32
      %33 = vector.broadcast %cst_13 : f32 to vector<32x1xf32>
      %c0_14 = arith.constant 0 : index
      %c0_15 = arith.constant 0 : index
      %34 = vector.load %arg3[%c0_14, %c0_15] : memref<32x1xf32, #tpu.memory_space<vmem>>, vector<32x1xf32>
      tpu.vector_store %arg3[%c0_14, %c0_15], %33 {strides = array<i32>} : memref<32x1xf32, #tpu.memory_space<vmem>>, vector<32x1xf32>,
      %cst_16 = arith.constant 0.000000e+00 : f32
      %35 = vector.broadcast %cst_16 : f32 to vector<32x1xf32>
      %c0_17 = arith.constant 0 : index
      %c0_18 = arith.constant 0 : index
      %36 = vector.load %arg4[%c0_17, %c0_18] : memref<32x1xf32, #tpu.memory_space<vmem>>, vector<32x1xf32>
      tpu.vector_store %arg4[%c0_17, %c0_18], %35 {strides = array<i32>} : memref<32x1xf32, #tpu.memory_space<vmem>>, vector<32x1xf32>,
    } else {
    }
    %c0 = arith.constant 0 : index
    %c0_1 = arith.constant 0 : index
    %3 = vector.load %arg1[%c0, %c0_1] : memref<32x3xf32, #tpu.memory_space<vmem>>, vector<32x3xf32>
    %c0_2 = arith.constant 0 : index
    %c0_3 = arith.constant 0 : index
    %4 = vector.load %arg2[%c0_2, %c0_3] : memref<3x128xf32, #tpu.memory_space<vmem>>, vector<3x128xf32>
    %5 = vector.extract_strided_slice %3 {offsets = [0, 0], sizes = [32, 1], strides = [1, 1]} : vector<32x3xf32> to vector<32x1xf32>
    %6 = vector.extract_strided_slice %4 {offsets = [0, 0], sizes = [1, 128], strides = [1, 1]} : vector<3x128xf32> to vector<1x128xf32>
    %7 = vector.broadcast %5 : vector<32x1xf32> to vector<32x128xf32>
    %8 = vector.broadcast %6 : vector<1x128xf32> to vector<32x128xf32>
    %9 = arith.mulf %7, %8 : vector<32x128xf32>
    %10 = vector.extract_strided_slice %3 {offsets = [0, 1], sizes = [32, 1], strides = [1, 1]} : vector<32x3xf32> to vector<32x1xf32>
    %11 = vector.extract_strided_slice %4 {offsets = [1, 0], sizes = [1, 128], strides = [1, 1]} : vector<3x128xf32> to vector<1x128xf32>
    %12 = vector.broadcast %10 : vector<32x1xf32> to vector<32x128xf32>
    %13 = vector.broadcast %11 : vector<1x128xf32> to vector<32x128xf32>
    %14 = arith.mulf %12, %13 : vector<32x128xf32>
    %15 = arith.addf %9, %14 : vector<32x128xf32>
    %16 = vector.extract_strided_slice %3 {offsets = [0, 2], sizes = [32, 1], strides = [1, 1]} : vector<32x3xf32> to vector<32x1xf32>
    %17 = vector.extract_strided_slice %4 {offsets = [2, 0], sizes = [1, 128], strides = [1, 1]} : vector<3x128xf32> to vector<1x128xf32>
    %18 = vector.broadcast %16 : vector<32x1xf32> to vector<32x128xf32>
    %19 = vector.broadcast %17 : vector<1x128xf32> to vector<32x128xf32>
    %20 = arith.mulf %18, %19 : vector<32x128xf32>
    %21 = arith.addf %15, %20 : vector<32x128xf32>
    %c0_4 = arith.constant 0 : index
    %c0_5 = arith.constant 0 : index
    %22 = vector.load %arg3[%c0_4, %c0_5] : memref<32x1xf32, #tpu.memory_space<vmem>>, vector<32x1xf32>
    %cst = arith.constant dense<0.000000e+00> : vector<32xf32>
    %23 = vector.multi_reduction <add>, %21, %cst [1] : vector<32x128xf32> to vector<32xf32>
    %24 = vector.shape_cast %23 : vector<32xf32> to vector<32x1xf32>
    %25 = arith.addf %22, %24 : vector<32x1xf32>
    %c0_6 = arith.constant 0 : index
    %c0_7 = arith.constant 0 : index
    %26 = vector.load %arg3[%c0_6, %c0_7] : memref<32x1xf32, #tpu.memory_space<vmem>>, vector<32x1xf32>
    tpu.vector_store %arg3[%c0_6, %c0_7], %25 {strides = array<i32>} : memref<32x1xf32, #tpu.memory_space<vmem>>, vector<32x1xf32>,
    %c0_8 = arith.constant 0 : index
    %c0_9 = arith.constant 0 : index
    %27 = vector.load %arg4[%c0_8, %c0_9] : memref<32x1xf32, #tpu.memory_space<vmem>>, vector<32x1xf32>
    %28 = arith.mulf %21, %21 : vector<32x128xf32>
    %cst_10 = arith.constant dense<0.000000e+00> : vector<32xf32>
    %29 = vector.multi_reduction <add>, %28, %cst_10 [1] : vector<32x128xf32> to vector<32xf32>
    %30 = vector.shape_cast %29 : vector<32xf32> to vector<32x1xf32>
    %31 = arith.addf %27, %30 : vector<32x1xf32>
    %c0_11 = arith.constant 0 : index
    %c0_12 = arith.constant 0 : index
    %32 = vector.load %arg4[%c0_11, %c0_12] : memref<32x1xf32, #tpu.memory_space<vmem>>, vector<32x1xf32>
    tpu.vector_store %arg4[%c0_11, %c0_12], %31 {strides = array<i32>} : memref<32x1xf32, #tpu.memory_space<vmem>>, vector<32x1xf32>,
    return
  }
  func.func @transform_0(%arg0: i32) -> (i32, i32) {
    %c0_i32 = arith.constant 0 : i32
    %c0_i32_0 = arith.constant 0 : i32
    %c0_i32_1 = arith.constant 0 : i32
    return %c0_i32, %c0_i32_0 : i32, i32
  }
  func.func @transform_1(%arg0: i32) -> (i32, i32) {
    %c0_i32 = arith.constant 0 : i32
    %c0_i32_0 = arith.constant 0 : i32
    return %c0_i32, %arg0 : i32, i32
  }
  func.func @transform_2(%arg0: i32) -> (i32, i32) {
    %c0_i32 = arith.constant 0 : i32
    %c0_i32_0 = arith.constant 0 : i32
    %c0_i32_1 = arith.constant 0 : i32
    return %c0_i32, %c0_i32_0 : i32, i32
  }
  func.func @transform_3(%arg0: i32) -> (i32, i32) {
    %c0_i32 = arith.constant 0 : i32
    %c0_i32_0 = arith.constant 0 : i32
    %c0_i32_1 = arith.constant 0 : i32
    return %c0_i32, %c0_i32_0 : i32, i32
  }
}

</mosaic_0001>

<bundles_post_ra>
// kernel: tpu_custom_call.1
= control target key start
LH: loop header
LB: loop body
LE: loop exit
PB: predicated region body
PF: predicated region fallthrough
CT: control target
= control target key end

     0   :  { %v171_v0 = vmov 0   ;;  %v172_v3 = vmov 1   ;;  %v173_v6 = vmov 2   ;;  %vm17_vm0 = vcmask 7168   ;;  %s298_s0 = inlined_call_operand.vmem [shape: f32[32,3], index: 0, kind: input, shape index: {}]   ;;  %s299_s1 = inlined_call_operand.vmem [shape: f32[3,128], index: 1, kind: input, shape index: {}]   ;;  %s300_s2 = inlined_call_operand.vmem [shape: f32[32,1], index: 2, kind: output, shape index: {0}]   ;;  %s301_s3 = inlined_call_operand.vmem [shape: f32[32,1], index: 3, kind: output, shape index: {1}]  }
   0x1   :  { %164 = vset.pattern.permute.xlu1 %v171_v0  ;;  %163 = vset.pattern.permute.xlu0 %v171_v0  ;;  %v28_v1 = vld [vmem:[%s298_s0 + $0x10] sm:$0xff]  ;;  %v26_v2 = vld [vmem:[%s298_s0] sm:$0xff]  ;;  %v29_v4 = vld [vmem:[%s298_s0 + $0x18] sm:$0xff]  ;;  %v174_v35 = vmov 0.0  }
   0x2   :  { %43 = vperm.xlu1 %164, %v28_v1   ;;  %33 = vperm.xlu0 %163, %v26_v2   ;;  %v27_v5 = vld [vmem:[%s298_s0 + $0x8] sm:$0xff]  ;;  %v30_v9 = vld [vmem:[%s299_s1] sm:$0x7]  ;;  %18 = vst.msk [vmem:[%s300_s2] sm:$0xff] %vm17_vm0, %v174_v35 }
   0x3   :  { %165 = vset.pattern.permute.xlu2 %v172_v3  ;;  %v72_v10 = vperm.slane %v30_v9, 1  ;;  %v97_v11 = vperm.slane %v30_v9, 2  ;;  %v51_v14 = vperm.slane %v30_v9, 0  ;;  %19 = vst.msk [vmem:[%s300_s2 + $0x8] sm:$0xff] %vm17_vm0, %v174_v35 }
   0x4   :  { %57 = vperm.xlu2 %165, %v26_v2   ;;  %20 = vst.msk [vmem:[%s300_s2 + $0x10] sm:$0xff] %vm17_vm0, %v174_v35 }
   0x5   :  { %21 = vst.msk [vmem:[%s300_s2 + $0x18] sm:$0xff] %vm17_vm0, %v174_v35 }
   0x6   :  { %22 = vst.msk [vmem:[%s301_s3] sm:$0xff] %vm17_vm0, %v174_v35 }
   0x7   :  { %23 = vst.msk [vmem:[%s301_s3 + $0x8] sm:$0xff] %vm17_vm0, %v174_v35 }
   0x8   :  { %24 = vst.msk [vmem:[%s301_s3 + $0x10] sm:$0xff] %vm17_vm0, %v174_v35 }
   0x9   :  { %25 = vst.msk [vmem:[%s301_s3 + $0x18] sm:$0xff] %vm17_vm0, %v174_v35  ;;  %v106_v48 = vld [vmem:[%s300_s2] sm:$0xff] }
   0xa   :  { %48 = vperm.xlu1 %164, %v29_v4   ;;  %38 = vperm.xlu0 %163, %v27_v5   ;;  %v107_v60 = vld [vmem:[%s300_s2 + $0x8] sm:$0xff] }
   0xb   :  { %v108_v54 = vld [vmem:[%s300_s2 + $0x10] sm:$0xff] }
   0xc   :  { %61 = vperm.xlu2 %165, %v27_v5   ;;  %v109_v63 = vld [vmem:[%s300_s2 + $0x18] sm:$0xff] }
   0xd   :  { %v127_v51 = vld [vmem:[%s301_s3] sm:$0xff] }
   0xf   :  { %v129_v56 = vld [vmem:[%s301_s3 + $0x10] sm:$0xff] }
  0x12   :  { %167 = vset.pattern.permute.xlu1 %v172_v3  ;;  %166 = vset.pattern.permute.xlu0 %v172_v3 }
  0x13   :  { %69 = vperm.xlu1 %167, %v29_v4   ;;  %65 = vperm.xlu0 %166, %v28_v1  }
  0x14   :  { %168 = vset.pattern.permute.xlu2 %v173_v6 }
  0x15   :  { %82 = vperm.xlu2 %168, %v26_v2   ;;  %v128_v2 = vld [vmem:[%s301_s3 + $0x8] sm:$0xff] }
  0x1b   :  { %169 = vset.pattern.permute.xlu1 %v173_v6  ;;  %170 = vset.pattern.permute.xlu0 %v173_v6 }
  0x1c   :  { %86 = vperm.xlu1 %169, %v27_v5   ;;  %94 = vperm.xlu0 %170, %v29_v4   ;;  %v130_v5 = vld [vmem:[%s301_s3 + $0x18] sm:$0xff] }
  0x1d   :  { %90 = vperm.xlu2 %168, %v28_v1  }
  0x5e   :  { %v58_v7 = vpop.permute.xlu2 %57 }
  0x5f   :  { %v73_v13 = vmul.f32 %v72_v10, %v58_v7 }
  0x66   :  { %v62_v8 = vpop.permute.xlu2 %61 }
  0x67   :  { %v74_v32 = vmul.f32 %v72_v10, %v62_v8 }
  0x6f   :  { %v83_v12 = vpop.permute.xlu2 %82 }
  0x70   :  { %v98_v18 = vmul.f32 %v97_v11, %v83_v12 }
  0x74   :  { %v44_v15 = vpop.permute.xlu1 %43  ;;  %v34_v16 = vpop.permute.xlu0 %33 }
  0x75   :  { %v52_v17 = vmul.f32 %v51_v14, %v34_v16  ;;  %v54_v27 = vmul.f32 %v51_v14, %v44_v15 }
  0x77   :  { %v77_v19 = vadd.f32 %v73_v13, %v52_v17  ;;  %v91_v24 = vpop.permute.xlu2 %90 }
  0x78   :  { %v100_v29 = vmul.f32 %v97_v11, %v91_v24 }
  0x79   :  { %v102_v20 = vadd.f32 %v98_v18, %v77_v19 }
  0x7b   :  { %110 = vadd.xlane.f32.xlu1 %v102_v20  ;;  %v131_v23 = vmul.f32 %v102_v20, %v102_v20 }
  0x7c   :  { %v49_v21 = vpop.permute.xlu1 %48  ;;  %v39_v22 = vpop.permute.xlu0 %38 }
  0x7d   :  { %v53_v33 = vmul.f32 %v51_v14, %v39_v22  ;;  %v55_v42 = vmul.f32 %v51_v14, %v49_v21 }
  0x7f   :  { %v78_v37 = vadd.f32 %v74_v32, %v53_v33 }
  0x83   :  { %135 = vadd.xlane.f32.xlu1 %v131_v23 }
  0x85   :  { %v70_v25 = vpop.permute.xlu1 %69  ;;  %v66_v26 = vpop.permute.xlu0 %65 }
  0x86   :  { %v75_v28 = vmul.f32 %v72_v10, %v66_v26  ;;  %v76_v41 = vmul.f32 %v72_v10, %v70_v25 }
  0x88   :  { %v79_v30 = vadd.f32 %v75_v28, %v54_v27  ;;  %v80_v44 = vadd.f32 %v76_v41, %v55_v42 }
  0x8a   :  { %v104_v31 = vadd.f32 %v100_v29, %v79_v30 }
  0x8c   :  { %114 = vadd.xlane.f32.xlu0 %v104_v31  ;;  %v133_v34 = vmul.f32 %v104_v31, %v104_v31 }
  0x8e   :  { %v87_v36 = vpop.permute.xlu1 %86  ;;  %139 = vadd.xlane.f32.xlu1 %v133_v34  ;;  %v95_v40 = vpop.permute.xlu0 %94 }
  0x8f   :  { %v99_v38 = vmul.f32 %v97_v11, %v87_v36  ;;  %v101_v43 = vmul.f32 %v97_v11, %v95_v40 }
  0x91   :  { %v103_v39 = vadd.f32 %v99_v38, %v78_v37  ;;  %v105_v45 = vadd.f32 %v101_v43, %v80_v44 }
  0x93   :  { %112 = vadd.xlane.f32.xlu2 %v103_v39  ;;  %v132_v46 = vmul.f32 %v103_v39, %v103_v39  ;;  %v134_v47 = vmul.f32 %v105_v45, %v105_v45 }
  0x9b   :  { %116 = vadd.xlane.f32.xlu2 %v105_v45 }
  0xa3   :  { %137 = vadd.xlane.f32.xlu2 %v132_v46 }
  0xab   :  { %141 = vadd.xlane.f32.xlu2 %v134_v47 }
  0xee   :  { %v111_v49 = vpop.xlane.xlu1 %110 }
  0xef   :  { %v118_v50 = vadd.f32 %v111_v49, %v106_v48 }
  0xf1   :  { %123 = vst.msk [vmem:[%s300_s2] sm:$0xff] %vm17_vm0, %v118_v50 }
  0xf6   :  { %v136_v52 = vpop.xlane.xlu1 %135 }
  0xf7   :  { %v143_v53 = vadd.f32 %v136_v52, %v127_v51 }
  0xf9   :  { %147 = vst.msk [vmem:[%s301_s3] sm:$0xff] %vm17_vm0, %v143_v53 }
  0xff   :  { %v115_v55 = vpop.xlane.xlu0 %114 }
 0x100   :  { %v120_v57 = vadd.f32 %v115_v55, %v108_v54 }
 0x101   :  { %v140_v58 = vpop.xlane.xlu1 %139 }
 0x102   :  { %125 = vst.msk [vmem:[%s300_s2 + $0x10] sm:$0xff] %vm17_vm0, %v120_v57  ;;  %v145_v59 = vadd.f32 %v140_v58, %v129_v56 }
 0x104   :  { %149 = vst.msk [vmem:[%s301_s3 + $0x10] sm:$0xff] %vm17_vm0, %v145_v59 }
 0x106   :  { %v113_v61 = vpop.xlane.xlu2 %112 }
 0x107   :  { %v119_v62 = vadd.f32 %v113_v61, %v107_v60 }
 0x109   :  { %124 = vst.msk [vmem:[%s300_s2 + $0x8] sm:$0xff] %vm17_vm0, %v119_v62 }
 0x10e   :  { %v117_v0 = vpop.xlane.xlu2 %116 }
 0x10f   :  { %v121_v1 = vadd.f32 %v117_v0, %v109_v63 }
 0x111   :  { %126 = vst.msk [vmem:[%s300_s2 + $0x18] sm:$0xff] %vm17_vm0, %v121_v1 }
 0x116   :  { %v138_v3 = vpop.xlane.xlu2 %137 }
 0x117   :  { %v144_v4 = vadd.f32 %v138_v3, %v128_v2 }
 0x119   :  { %148 = vst.msk [vmem:[%s301_s3 + $0x8] sm:$0xff] %vm17_vm0, %v144_v4 }
 0x11e   :  { %v142_v6 = vpop.xlane.xlu2 %141 }
 0x11f   :  { %v146_v7 = vadd.f32 %v142_v6, %v130_v5 }
 0x121   :  { %150 = vst.msk [vmem:[%s301_s3 + $0x18] sm:$0xff] %vm17_vm0, %v146_v7 }

</bundles_post_ra>
